<compile_context>
chip_gen: v7x
topology: tpu7x:2x2x1
jax: 0.10.0
libtpu: 0.0.40
codegen_flags: <defaults>
</compile_context>

<pallas_src>
import jax
import jax.numpy as jnp
from jax.experimental import pallas as pl
from jax.experimental.pallas import tpu as pltpu


def _attn_row0_kernel(x0_ref, y_ref, bias_ref, wqT_ref, wk_ref, out_ref, attn_ref):
    # Blocks (per grid step, G = BN-tile rows):
    #   x0_ref:  (G, Dx)      query-side input, row 0 only
    #   y_ref:   (G, Ty, Dy)  key/value-side input
    #   bias_ref:(G, Ty)      additive mask bias (0 keep / -1e10 drop), f32
    #   wqT_ref: (Dx, Dx)     W_q^T (pre-transposed in the wrapper)
    #   wk_ref:  (Dx, Dy)     W_k in torch layout (used un-transposed)
    #   out_ref: (G, Dy)      attended values (row 0)
    #   attn_ref:(G, Ty)      attention weights (row 0)
    x0 = x0_ref[...]
    # q = x0 @ W_q^T                                   -> (G, Dx)   (MXU)
    q = jnp.dot(x0, wqT_ref[...], preferred_element_type=jnp.float32)
    # r = q @ W_k  ( == W_k^T q ), so that <q, k_t> == <r, y_t>  -> (G, Dy)  (MXU)
    r = jnp.dot(q, wk_ref[...], preferred_element_type=jnp.float32)

    y = y_ref[...].astype(jnp.float32)                               # (G, Ty, Dy)

    # Scores s[g, t] = <r[g], y[g, t]> + mask_bias   (VPU mul + lane reduce)
    # NOTE: additive -1e10 bias matches torch.where(mask, s, -1e10) whenever each row
    # has at least one valid position (guaranteed by the module's usage).
    s = jnp.sum(y * r[:, None, :], axis=-1) + bias_ref[...]          # (G, Ty)

    # Numerically stable softmax over the last axis.
    s_max = jnp.max(s, axis=-1, keepdims=True)
    e = jnp.exp(s - s_max)
    w = e * pl.reciprocal(jnp.sum(e, axis=-1, keepdims=True), approx=True)  # (G, Ty)

    # out[g, d] = sum_t w[g, t] * y[g, t, d]          (VPU mul + sublane reduce)
    out = jnp.sum(y * w[:, :, None], axis=1)                         # (G, Dy)

    out_ref[...] = out.astype(out_ref.dtype)
    attn_ref[...] = w.astype(attn_ref.dtype)


def _choose_bn_tile(bn, ty, dy, dx, itemsize=4, vmem_budget=8 * 1024 * 1024):
    """Pick the BN tile size G: sublane-aligned (multiple of 8 or == BN), large enough
    to amortize per-grid-step overhead, small enough that the double-buffered blocks
    fit comfortably in scoped VMEM (conservative so it also fits v7x's smaller VMEM)."""
    per_row_bytes = (dx + ty * dy + ty + dy + ty) * itemsize * 2  # x0+y+bias+out+attn, 2x buffered
    cap = max(8, (vmem_budget // max(per_row_bytes, 1)) // 8 * 8)
    cap = min(cap, 512)
    if bn <= cap:
        # Prefer >=2 grid steps (v7x megacore) when that keeps the tile 8-aligned.
        if bn >= 16 and (bn // 2) % 8 == 0:
            return bn // 2
        return bn
    return cap


def attention_layer(x, y, masks, w_query, w_key):
    """Pallas implementation of AttentionLayer.forward.

    x:        (B, N, Tx, x_dim)
    y:        (B, N, Ty, y_dim)
    masks:    (B, N, Ty)      nonzero = attend
    w_query:  (x_dim, x_dim)  torch nn.Linear weight (out_features, in_features)
    w_key:    (x_dim, y_dim)  torch nn.Linear weight

    Returns (attended[:, :, 0, :], attn_weights[:, :, 0, :]) — same as the module.
    """
    B, N, Tx, Dx = x.shape
    _, _, Ty, Dy = y.shape
    BN = B * N

    # Glue (one-time layout plumbing, done by XLA outside the kernel):
    # only query row 0 is ever used by the module's outputs.
    x0 = x[:, :, 0, :].reshape(BN, Dx)
    y2 = y.reshape(BN, Ty, Dy)
    bias = jnp.where(masks.reshape(BN, Ty) != 0, 0.0, -1e10).astype(jnp.float32)
    wqT = jnp.asarray(w_query).T            # (Dx, Dx): q = x0 @ W_q^T
    wk = jnp.asarray(w_key)                 # (Dx, Dy): used un-transposed in the kernel

    G = _choose_bn_tile(BN, Ty, Dy, Dx, itemsize=x.dtype.itemsize)
    BN_pad = -(-BN // G) * G
    if BN_pad != BN:
        pad = BN_pad - BN
        x0 = jnp.pad(x0, ((0, pad), (0, 0)))
        y2 = jnp.pad(y2, ((0, pad), (0, 0), (0, 0)))
        bias = jnp.pad(bias, ((0, pad), (0, 0)))

    grid = (BN_pad // G,)
    out2, attn2 = pl.pallas_call(
        _attn_row0_kernel,
        out_shape=(
            jax.ShapeDtypeStruct((BN_pad, Dy), jnp.float32),
            jax.ShapeDtypeStruct((BN_pad, Ty), jnp.float32),
        ),
        grid_spec=pltpu.PrefetchScalarGridSpec(
            num_scalar_prefetch=0,
            grid=grid,
            in_specs=[
                pl.BlockSpec((G, Dx), lambda i: (i, 0)),
                pl.BlockSpec((G, Ty, Dy), lambda i: (i, 0, 0)),
                pl.BlockSpec((G, Ty), lambda i: (i, 0)),
                pl.BlockSpec((Dx, Dx), lambda i: (0, 0)),
                pl.BlockSpec((Dx, Dy), lambda i: (0, 0)),
            ],
            out_specs=[
                pl.BlockSpec((G, Dy), lambda i: (i, 0)),
                pl.BlockSpec((G, Ty), lambda i: (i, 0)),
            ],
        ),
        compiler_params=pltpu.CompilerParams(
            dimension_semantics=("parallel",),
        ),
    )(x0, y2, bias, wqT, wk)

    out = out2[:BN].reshape(B, N, Dy)
    attn = attn2[:BN].reshape(B, N, Ty)
    return out, attn


def _reference(x, y, masks, w_query, w_key):
    # Pure-JAX reference mirroring the PyTorch forward exactly (full Tx, then slice).
    q = jnp.einsum("bntd,ed->bnte", x, w_query)      # query(x)
    k = jnp.einsum("bnsd,ed->bnse", y, w_key)        # key(y)
    w = jnp.einsum("bnte,bnse->bnts", q, k)          # q @ k^T
    m = (masks != 0)[:, :, None, :]                  # masks.unsqueeze(2).bool()
    w = jnp.where(m, w, jnp.float32(-1e10))
    w = jax.nn.softmax(w, axis=-1)
    out = jnp.einsum("bnts,bnsd->bntd", w, y)
    return out[:, :, 0, :], w[:, :, 0, :]


if __name__ == "__main__":
    # Small, PyTorch-forward-consistent shapes.
    B, N, Tx, Ty = 2, 4, 8, 8
    x_dim, y_dim = 32, 32

    key = jax.random.PRNGKey(0)
    kx, ky, km, kq, kk = jax.random.split(key, 5)

    x = jax.random.normal(kx, (B, N, Tx, x_dim), dtype=jnp.float32)
    y = jax.random.normal(ky, (B, N, Ty, y_dim), dtype=jnp.float32)

    # Deterministic binary masks; force position 0 to be valid in every row.
    masks = (jax.random.uniform(km, (B, N, Ty)) > 0.3).astype(jnp.float32)
    masks = masks.at[:, :, 0].set(1.0)

    # Deterministic weights (same shapes as nn.Linear(y_dim, x_dim) / (x_dim, x_dim)).
    bound_q = 1.0 / (x_dim ** 0.5)
    bound_k = 1.0 / (y_dim ** 0.5)
    w_query = jax.random.uniform(kq, (x_dim, x_dim), minval=-bound_q, maxval=bound_q)
    w_key = jax.random.uniform(kk, (x_dim, y_dim), minval=-bound_k, maxval=bound_k)

    out, attn = attention_layer(x, y, masks, w_query, w_key)
    out, attn = jax.block_until_ready((out, attn))

    ref_out, ref_attn = _reference(x, y, masks, w_query, w_key)
    assert out.shape == (B, N, y_dim)
    assert attn.shape == (B, N, Ty)
    # Tolerances relaxed (vs 1e-5) for the EUP approximate reciprocal in the softmax
    # denominator and the re-associated key projection.
    assert jnp.allclose(out, ref_out, atol=2e-3, rtol=2e-3)
    assert jnp.allclose(attn, ref_attn, atol=2e-3, rtol=2e-3)

    print("KERNEL_OK")
</pallas_src>

<mosaic_0001>
module attributes {stable_mosaic.version = 11 : i64} {
  func.func @_attn_row0_kernel(%arg0: i32, %arg1: memref<8x32xf32, #tpu.memory_space<vmem>>, %arg2: memref<8x8x32xf32, #tpu.memory_space<vmem>>, %arg3: memref<8x8xf32, #tpu.memory_space<vmem>>, %arg4: memref<32x32xf32, #tpu.memory_space<vmem>>, %arg5: memref<32x32xf32, #tpu.memory_space<vmem>>, %arg6: memref<8x32xf32, #tpu.memory_space<vmem>>, %arg7: memref<8x8xf32, #tpu.memory_space<vmem>>) attributes {dimension_semantics = [#tpu.dimension_semantics<parallel>], iteration_bounds = array<i64: 1>, scalar_prefetch = 0 : i64, scratch_operands = 0 : i64, tpu.core_type = #tpu.core_type<tc>, window_params = [{transform_indices = @transform_0, window_bounds = array<i64: 8, 32>}, {transform_indices = @transform_1, window_bounds = array<i64: 8, 8, 32>}, {transform_indices = @transform_2, window_bounds = array<i64: 8, 8>}, {pipeline_mode = #tpu.pipeline_mode<synchronous>, transform_indices = @transform_3, window_bounds = array<i64: 32, 32>}, {pipeline_mode = #tpu.pipeline_mode<synchronous>, transform_indices = @transform_4, window_bounds = array<i64: 32, 32>}, {transform_indices = @transform_5, window_bounds = array<i64: 8, 32>}, {transform_indices = @transform_6, window_bounds = array<i64: 8, 8>}]} {
    %c0 = arith.constant 0 : index
    %c0_0 = arith.constant 0 : index
    %0 = vector.load %arg1[%c0, %c0_0] : memref<8x32xf32, #tpu.memory_space<vmem>>, vector<8x32xf32>
    %c0_1 = arith.constant 0 : index
    %c0_2 = arith.constant 0 : index
    %1 = vector.load %arg4[%c0_1, %c0_2] : memref<32x32xf32, #tpu.memory_space<vmem>>, vector<32x32xf32>
    %cst = arith.constant dense<0.000000e+00> : vector<8x32xf32>
    %2 = tpu.matmul %0, %1, %cst {dimension_numbers = #tpu.dot_dimension_numbers<[1], [0], [0], [1], [0, 0, 1, 1], [], []>} : vector<8x32xf32>, vector<32x32xf32>, vector<8x32xf32> -> vector<8x32xf32>
    %c0_3 = arith.constant 0 : index
    %c0_4 = arith.constant 0 : index
    %3 = vector.load %arg5[%c0_3, %c0_4] : memref<32x32xf32, #tpu.memory_space<vmem>>, vector<32x32xf32>
    %cst_5 = arith.constant dense<0.000000e+00> : vector<8x32xf32>
    %4 = tpu.matmul %2, %3, %cst_5 {dimension_numbers = #tpu.dot_dimension_numbers<[1], [0], [0], [1], [0, 0, 1, 1], [], []>} : vector<8x32xf32>, vector<32x32xf32>, vector<8x32xf32> -> vector<8x32xf32>
    %c0_6 = arith.constant 0 : index
    %c0_7 = arith.constant 0 : index
    %c0_8 = arith.constant 0 : index
    %5 = vector.load %arg2[%c0_6, %c0_7, %c0_8] : memref<8x8x32xf32, #tpu.memory_space<vmem>>, vector<8x8x32xf32>
    %6 = vector.shape_cast %4 : vector<8x32xf32> to vector<8x1x32xf32>
    %7 = vector.broadcast %6 : vector<8x1x32xf32> to vector<8x8x32xf32>
    %8 = arith.mulf %5, %7 : vector<8x8x32xf32>
    %cst_9 = arith.constant dense<0.000000e+00> : vector<8x8xf32>
    %9 = vector.multi_reduction <add>, %8, %cst_9 [2] : vector<8x8x32xf32> to vector<8x8xf32>
    %c0_10 = arith.constant 0 : index
    %c0_11 = arith.constant 0 : index
    %10 = vector.load %arg3[%c0_10, %c0_11] : memref<8x8xf32, #tpu.memory_space<vmem>>, vector<8x8xf32>
    %11 = arith.addf %9, %10 : vector<8x8xf32>
    %cst_12 = arith.constant dense<0xFF800000> : vector<8xf32>
    %12 = vector.multi_reduction <maximumf>, %11, %cst_12 [1] : vector<8x8xf32> to vector<8xf32>
    %13 = vector.shape_cast %12 : vector<8xf32> to vector<8x1xf32>
    %14 = vector.broadcast %13 : vector<8x1xf32> to vector<8x8xf32>
    %15 = arith.subf %11, %14 : vector<8x8xf32>
    %16 = math.exp %15 : vector<8x8xf32>
    %cst_13 = arith.constant dense<0.000000e+00> : vector<8xf32>
    %17 = vector.multi_reduction <add>, %16, %cst_13 [1] : vector<8x8xf32> to vector<8xf32>
    %18 = vector.shape_cast %17 : vector<8xf32> to vector<8x1xf32>
    %19 = tpu.reciprocal %18 {approx = true} : vector<8x1xf32> -> vector<8x1xf32>
    %20 = vector.broadcast %19 : vector<8x1xf32> to vector<8x8xf32>
    %21 = arith.mulf %16, %20 : vector<8x8xf32>
    %22 = vector.shape_cast %21 : vector<8x8xf32> to vector<8x8x1xf32>
    %23 = vector.broadcast %22 : vector<8x8x1xf32> to vector<8x8x32xf32>
    %24 = arith.mulf %5, %23 : vector<8x8x32xf32>
    %cst_14 = arith.constant dense<0.000000e+00> : vector<8x32xf32>
    %25 = vector.multi_reduction <add>, %24, %cst_14 [1] : vector<8x8x32xf32> to vector<8x32xf32>
    %c0_15 = arith.constant 0 : index
    %c0_16 = arith.constant 0 : index
    %26 = vector.load %arg6[%c0_15, %c0_16] : memref<8x32xf32, #tpu.memory_space<vmem>>, vector<8x32xf32>
    tpu.vector_store %arg6[%c0_15, %c0_16], %25 {strides = array<i32>} : memref<8x32xf32, #tpu.memory_space<vmem>>, vector<8x32xf32>,
    %c0_17 = arith.constant 0 : index
    %c0_18 = arith.constant 0 : index
    %27 = vector.load %arg7[%c0_17, %c0_18] : memref<8x8xf32, #tpu.memory_space<vmem>>, vector<8x8xf32>
    tpu.vector_store %arg7[%c0_17, %c0_18], %21 {strides = array<i32>} : memref<8x8xf32, #tpu.memory_space<vmem>>, vector<8x8xf32>,
    return
  }
  func.func @transform_0(%arg0: i32) -> (i32, i32) {
    %c0_i32 = arith.constant 0 : i32
    %c0_i32_0 = arith.constant 0 : i32
    return %arg0, %c0_i32 : i32, i32
  }
  func.func @transform_1(%arg0: i32) -> (i32, i32, i32) {
    %c0_i32 = arith.constant 0 : i32
    %c0_i32_0 = arith.constant 0 : i32
    %c0_i32_1 = arith.constant 0 : i32
    return %arg0, %c0_i32, %c0_i32_0 : i32, i32, i32
  }
  func.func @transform_2(%arg0: i32) -> (i32, i32) {
    %c0_i32 = arith.constant 0 : i32
    %c0_i32_0 = arith.constant 0 : i32
    return %arg0, %c0_i32 : i32, i32
  }
  func.func @transform_3(%arg0: i32) -> (i32, i32) {
    %c0_i32 = arith.constant 0 : i32
    %c0_i32_0 = arith.constant 0 : i32
    %c0_i32_1 = arith.constant 0 : i32
    return %c0_i32, %c0_i32_0 : i32, i32
  }
  func.func @transform_4(%arg0: i32) -> (i32, i32) {
    %c0_i32 = arith.constant 0 : i32
    %c0_i32_0 = arith.constant 0 : i32
    %c0_i32_1 = arith.constant 0 : i32
    return %c0_i32, %c0_i32_0 : i32, i32
  }
  func.func @transform_5(%arg0: i32) -> (i32, i32) {
    %c0_i32 = arith.constant 0 : i32
    %c0_i32_0 = arith.constant 0 : i32
    return %arg0, %c0_i32 : i32, i32
  }
  func.func @transform_6(%arg0: i32) -> (i32, i32) {
    %c0_i32 = arith.constant 0 : i32
    %c0_i32_0 = arith.constant 0 : i32
    return %arg0, %c0_i32 : i32, i32
  }
}

</mosaic_0001>

<bundles_post_ra>
// kernel: tpu_custom_call.1
= control target key start
LH: loop header
LB: loop body
LE: loop exit
PB: predicated region body
PF: predicated region fallthrough
CT: control target
= control target key end

     0   :  { %12 = vsyncpa [#allocation3], 0  ;;  %s1502_s0 = inlined_call_operand.hbm [shape: f32[8,32], index: 0, kind: input, shape index: {}]   ;;  %s1503_s1 = inlined_call_operand.hbm [shape: f32[8,8,32], index: 1, kind: input, shape index: {}]   ;;  %s1504_s2 = inlined_call_operand.hbm [shape: f32[8,8], index: 2, kind: input, shape index: {}]   ;;  %s1505_s3 = inlined_call_operand.hbm [shape: f32[32,32], index: 3, kind: input, shape index: {}]   ;;  %s1506_s4 = inlined_call_operand.hbm [shape: f32[32,32], index: 4, kind: input, shape index: {}]   ;;  %s1507_s5 = inlined_call_operand.hbm [shape: f32[8,32], index: 5, kind: output, shape index: {0}]   ;;  %s1508_s6 = inlined_call_operand.hbm [shape: f32[8,8], index: 6, kind: output, shape index: {1}]  }
   0x1   :  { %13 = vsyncpa [#allocation6], 0 }
   0x2   :  { %14 = vsyncpa [#allocation9], 0 }
   0x3   :  { %15 = vsyncpa [#allocation4], 0 }
   0x4   :  { %16 = vsyncpa [#allocation13], 0  ;;  %s1160_s21 = smov [#allocation5]   ;;  %s996_s25 = scalar_lea.hbm %s1503_s1, 1024 }
   0x5   :  { %s32_s22 = sshll.u32 %s1160_s21, 4  ;;  %p997_p0 = scmp.ne.s32.totalorder %s1503_s1, %s996_s25  ;;  %s33_s22 = int_to_ptr.vmem [resolvable:$true] %s32_s22 }
   0x6   :  { %p1000_p1 = scmp.lt.u32.totalorder %s996_s25, %s1503_s1 }
   0x8   :  { %p1002_p2 = pnand %p1000_p1, %p997_p0 }
   0xa   :  { %1005 = shalt.err (!%p1002_p2)
}
   0xb   :  { %s1006_s30 = scalar_lea.vmem %s33_s22, 1024  ;;  %p1011_p4 = scmp.lt.s32.totalorder %s33_s22, %s33_s22 }
   0xc   :  { %p1007_p3 = scmp.ne.s32.totalorder %s33_s22, %s1006_s30  ;;  %p1012_p5 = scmp.lt.s32.totalorder %s1006_s30, %s1006_s30 }
   0xe   :  { %p1013_p6 = por %p1012_p5, %p1011_p4 }
  0x10   :  { %p1014_p7 = pnand %p1013_p6, %p1007_p3 }
  0x12   :  { %1017 = shalt.err (!%p1014_p7)
}
  0x13   :  { %s1161_s7 = smov 128   ;;  %s1162_s8 = smov 8  }
  0x14   :  { %38 = dma.hbm_to_vmem [thread:$0]  %s1503_s1, 1024, %s33_s22, [#allocation6], %s1161_s7, %s1161_s7, %s1162_s8  }
  0x15   :  { %s1163_s11 = smov [#allocation8]   ;;  %s1164_s13 = smov [#allocation2]  }
  0x16   :  { %s54_s12 = sshll.u32 %s1163_s11, 4  ;;  %s23_s14 = sshll.u32 %s1164_s13, 4  ;;  %s55_s12 = int_to_ptr.vmem [resolvable:$true] %s54_s12  ;;  %s24_s14 = int_to_ptr.vmem [resolvable:$true] %s23_s14 }
  0x17   :  { %s1018_s17 = scalar_lea.hbm %s1505_s3, 512 }
  0x18   :  { %p1019_p8 = scmp.ne.s32.totalorder %s1505_s3, %s1018_s17  ;;  %p1022_p9 = scmp.lt.u32.totalorder %s1018_s17, %s1505_s3 }
  0x1a   :  { %p1024_p10 = pnand %p1022_p9, %p1019_p8 }
  0x1c   :  { %1027 = shalt.err (!%p1024_p10)
}
  0x1d   :  { %s1028_s1 = scalar_lea.vmem %s55_s12, 512  ;;  %p1033_p12 = scmp.lt.s32.totalorder %s55_s12, %s55_s12 }
  0x1e   :  { %p1029_p11 = scmp.ne.s32.totalorder %s55_s12, %s1028_s1  ;;  %p1034_p13 = scmp.lt.s32.totalorder %s1028_s1, %s1028_s1 }
  0x20   :  { %p1035_p0 = por %p1034_p13, %p1033_p12 }
  0x22   :  { %p1036_p1 = pnand %p1035_p0, %p1029_p11 }
  0x24   :  { %1039 = shalt.err (!%p1036_p1)
}
  0x25   :  { %60 = dma.hbm_to_vmem [thread:$0]  %s1505_s3, 512, %s55_s12, [#allocation9], %s1161_s7, %s1161_s7, %s1162_s8  }
  0x26   :  { %s1040_s26 = scalar_lea.hbm %s1502_s0, 128 }
  0x27   :  { %p1041_p2 = scmp.ne.s32.totalorder %s1502_s0, %s1040_s26  ;;  %p1044_p3 = scmp.lt.u32.totalorder %s1040_s26, %s1502_s0 }
  0x29   :  { %p1046_p4 = pnand %p1044_p3, %p1041_p2 }
  0x2b   :  { %1049 = shalt.err (!%p1046_p4)
}
  0x2c   :  { %s1050_s9 = scalar_lea.vmem %s24_s14, 128  ;;  %p1055_p6 = scmp.lt.s32.totalorder %s24_s14, %s24_s14 }
  0x2d   :  { %p1051_p5 = scmp.ne.s32.totalorder %s24_s14, %s1050_s9  ;;  %p1056_p7 = scmp.lt.s32.totalorder %s1050_s9, %s1050_s9 }
  0x2f   :  { %p1057_p8 = por %p1056_p7, %p1055_p6 }
  0x31   :  { %p1058_p9 = pnand %p1057_p8, %p1051_p5 }
  0x33   :  { %1061 = shalt.err (!%p1058_p9)
}
  0x34   :  { %26 = dma.hbm_to_vmem [thread:$0]  %s1502_s0, 128, %s24_s14, [#allocation3]  }
  0x35   :  { %s1165_s11 = smov [#allocation7]   ;;  %s1166_s13 = smov [#allocation10]  }
  0x36   :  { %s45_s12 = sshll.u32 %s1165_s11, 4  ;;  %s66_s15 = sshll.u32 %s1166_s13, 4  ;;  %s46_s12 = int_to_ptr.vmem [resolvable:$true] %s45_s12  ;;  %s67_s15 = int_to_ptr.vmem [resolvable:$true] %s66_s15 }
  0x37   :  { %s1062_s18 = scalar_lea.hbm %s1504_s2, 128 }
  0x38   :  { %p1063_p10 = scmp.ne.s32.totalorder %s1504_s2, %s1062_s18  ;;  %p1066_p11 = scmp.lt.u32.totalorder %s1062_s18, %s1504_s2 }
  0x3a   :  { %p1068_p12 = pnand %p1066_p11, %p1063_p10 }
  0x3c   :  { %1071 = shalt.err (!%p1068_p12)
}
  0x3d   :  { %s1072_s0 = scalar_lea.vmem %s46_s12, 128  ;;  %p1077_p0 = scmp.lt.s32.totalorder %s46_s12, %s46_s12 }
  0x3e   :  { %p1073_p13 = scmp.ne.s32.totalorder %s46_s12, %s1072_s0  ;;  %p1078_p1 = scmp.lt.s32.totalorder %s1072_s0, %s1072_s0 }
  0x40   :  { %p1079_p2 = por %p1078_p1, %p1077_p0 }
  0x42   :  { %p1080_p3 = pnand %p1079_p2, %p1073_p13 }
  0x44   :  { %1083 = shalt.err (!%p1080_p3)
}
  0x45   :  { %48 = dma.hbm_to_vmem [thread:$0]  %s1504_s2, 128, %s46_s12, [#allocation6]  }
  0x46   :  { %s1084_s25 = scalar_lea.hbm %s1506_s4, 512 }
  0x47   :  { %p1085_p4 = scmp.ne.s32.totalorder %s1506_s4, %s1084_s25  ;;  %p1088_p5 = scmp.lt.u32.totalorder %s1084_s25, %s1506_s4 }
  0x49   :  { %p1090_p6 = pnand %p1088_p5, %p1085_p4 }
  0x4b   :  { %1093 = shalt.err (!%p1090_p6)
}
  0x4c   :  { %s1094_s30 = scalar_lea.vmem %s67_s15, 512  ;;  %p1099_p8 = scmp.lt.s32.totalorder %s67_s15, %s67_s15 }
  0x4d   :  { %p1095_p7 = scmp.ne.s32.totalorder %s67_s15, %s1094_s30  ;;  %p1100_p9 = scmp.lt.s32.totalorder %s1094_s30, %s1094_s30 }
  0x4f   :  { %p1101_p10 = por %p1100_p9, %p1099_p8 }
  0x51   :  { %p1102_p11 = pnand %p1101_p10, %p1095_p7 }
  0x53   :  { %1105 = shalt.err (!%p1102_p11)
}
  0x54   :  { %72 = dma.hbm_to_vmem [thread:$0]  %s1506_s4, 512, %s67_s15, [#allocation9], %s1161_s7, %s1161_s7, %s1162_s8  }
  0x55   :  { %1150 = dma.done.wait [#allocation3], 128  }
  0x56   :  { %1151 = vsyncadd [#allocation3], 4294967168 }
  0x57   :  { %1152 = dma.done.wait [#allocation6], 1152  }
  0x58   :  { %1153 = vsyncadd [#allocation6], 4294966144 }
  0x59   :  { %1154 = dma.done.wait [#allocation9], 1024  }
  0x5a   :  { %1155 = vsyncadd [#allocation9], 4294966272  ;;  %v1167_v0 = vmov 0.0|0.0   ;;  %vm1168_vm0 = vmmov 0   ;;  %v1169_v1 = vmov 0.0   ;;  %v89_v2 = vld [vmem:[#allocation8] sm:$0xff]  ;;  %v257_v15 = vlaneseq }
  0x5b   :  { %950 = vmatprep.subr.bf16.mxu0 %v1167_v0  ;;  %936 = vmatprep.mubr.msk.f32.mxu0 %vm1168_vm0, %v1169_v1  ;;  %v90_v3 = vld [vmem:[#allocation8 + $0x8] sm:$0xff]  ;;  %v91_v4 = vld [vmem:[#allocation8 + $0x10] sm:$0xff]  ;;  %v92_v6 = vld [vmem:[#allocation8 + $0x18] sm:$0xff]  ;;  %vm93_vm1 = vcmask 261120   ;;  %v1170_v32 = vmov 1966171168  }
  0x5c   :  { %956 = vmatprep.subr.bf16.mxu1 %v1167_v0  ;;  %947 = vmatprep.mubr.msk.f32.mxu1 %vm1168_vm0, %v1169_v1  ;;  %v951_v5 = vpack.c.bf16 %v90_v3, %v89_v2  ;;  %v167_v7 = vld [vmem:[#allocation10] sm:$0xff]  ;;  %v168_v8 = vld [vmem:[#allocation10 + $0x8] sm:$0xff]  ;;  %v169_v9 = vld [vmem:[#allocation10 + $0x10] sm:$0xff]  ;;  %v954_v11 = vpack.c.bf16 %v92_v6, %v91_v4  ;;  %v1280_v16 = vshrl.u32 %v257_v15, 7  ;;  %v255_v33 = vunpack.c.l.s4 %v1170_v32  ;;  %s1172_s4 = smov [#allocation12]  }
  0x5d   :  { %v170_v10 = vld [vmem:[#allocation10 + $0x18] sm:$0xff]  ;;  %v957_v12 = vpack.c.bf16 %v168_v8, %v167_v7  ;;  %v88_v14 = vld [vmem:[#allocation2] sm:$0xff]  ;;  %v1319_v49 = vld [vmem:[#allocation5 + $0x10] sm:$0xff]  ;;  %vm514_vm2 = vcmask 1041409   ;;  %vm516_vm3 = vcmask 1042434   ;;  %vm518_vm4 = vcmask 1043459  }
  0x5e   :  { %952 = vmatpush3.bf16.msra.mxu0 %v951_v5  ;;  %v960_v13 = vpack.c.bf16 %v170_v10, %v169_v9  ;;  %v1282_v17 = vld [vmem:[#allocation7] sm:$0xff]  ;;  %v1285_v18 = vsub.s32 1, %v1280_v16  ;;  %v1288_v19 = vsub.s32 2, %v1280_v16  ;;  %v1291_v20 = vsub.s32 0, %v1280_v16  ;;  %v1322_v51 = vld [vmem:[#allocation5 + $0x8] sm:$0xff]  ;;  %v1326_v55 = vld [vmem:[#allocation5 + $0x18] sm:$0xff] }
  0x5f   :  { %953 = vmatprep.subr.bf16.mxu0 %v1167_v0  ;;  %958 = vmatpush3.bf16.msra.mxu1 %v957_v12  ;;  %v1294_v21 = vsub.s32 4, %v1280_v16  ;;  %v1303_v25 = vsub.s32 3, %v1280_v16  ;;  %v1310_v28 = vsub.s32 5, %v1280_v16  ;;  %v256_v34 = vunpack.c.0.s8 %v255_v33  ;;  %v1316_v46 = vld [vmem:[#allocation5] sm:$0xff]  ;;  %v1338_v4 = vld [vmem:[#allocation5 + $0x28] sm:$0xff]  ;;  %v1345_v10 = vld [vmem:[#allocation5 + $0x30] sm:$0xff] }
  0x60   :  { %959 = vmatprep.subr.bf16.mxu1 %v1167_v0  ;;  %v386_v22 = vrot.slane %v1282_v17, %v1285_v18  ;;  %v379_v23 = vrot.slane %v1282_v17, %v1291_v20  ;;  %v393_v24 = vrot.slane %v1282_v17, %v1288_v19  ;;  %v1335_v1 = vld [vmem:[#allocation5 + $0x20] sm:$0xff]  ;;  %v1348_v12 = vld [vmem:[#allocation5 + $0x38] sm:$0xff]  ;;  %vm520_vm5 = vcmask 1044484   ;;  %s901_s7 = sshll.u32 %s1172_s4, 4  ;;  %s902_s7 = int_to_ptr.vmem [resolvable:$true] %s901_s7 }
  0x61   :  { %v407_v26 = vrot.slane %v1282_v17, %v1294_v21  ;;  %v400_v27 = vrot.slane %v1282_v17, %v1303_v25  ;;  %v414_v29 = vrot.slane %v1282_v17, %v1310_v28  ;;  %v259_v35 = vsub.s32 %v256_v34, %v1280_v16  ;;  %s1106_s8 = scalar_lea.vmem %s902_s7, 128  ;;  %p1111_p13 = scmp.lt.s32.totalorder %s902_s7, %s902_s7 }
  0x62   :  { %955 = vmatpush3.bf16.msra.mxu0 %v954_v11  ;;  %388 = vbcast.lane.b32.xlu1 %v386_v22, 256  ;;  %vm522_vm6 = vcmask 1045509   ;;  %vm524_vm7 = vcmask 1046534   ;;  %vm526_vm8 = vcmask 1047559   ;;  %vm529_vm9 = vcmask 64512   ;;  %p1107_p12 = scmp.ne.s32.totalorder %s902_s7, %s1106_s8  ;;  %p1112_p0 = scmp.lt.s32.totalorder %s1106_s8, %s1106_s8 }
  0x63   :  { %961 = vmatpush3.bf16.msra.mxu1 %v960_v13  ;;  %381 = vbcast.lane.b32.xlu0 %v379_v23, 256 }
  0x64   :  { %p1113_p1 = por %p1112_p0, %p1111_p13 }
  0x65   :  { %937 = vmatmul.mubr.msk.f32.vlgmr.msra.gmra.mrb[0].mxu0 %vm93_vm1, %v88_v14 }
  0x66   :  { %395 = vbcast.lane.b32.xlu1 %v393_v24, 256  ;;  %p1114_p2 = pnand %p1113_p1, %p1107_p12 }
  0x67   :  { %409 = vbcast.lane.b32.xlu0 %v407_v26, 256 }
  0x6a   :  { %402 = vbcast.lane.b32.xlu1 %v400_v27, 256  ;;  %v1171_v27 = vmov 0  }
  0x6b   :  { %976 = vset.pattern.permute.xlu0 %v1171_v27  ;;  %977 = vset.pattern.permute.xlu1 %v1171_v27 }
  0x6e   :  { %416 = vbcast.lane.b32.xlu1 %v414_v29, 256  ;;  %v1357_v29 = vsub.s32 7, %v1280_v16 }
  0xd4   :  { %v389_v33 = vpop.permute.xlu1 %388 }
  0xd8   :  { %v396_v34 = vpop.permute.xlu1 %395 }
 0x138   :  { %v163_v30 = vpop.f32.mrb[0].mxu0 }
 0x139   :  { %v938_v31 = vpop.f32.mrb[1].mxu0  ;;  %948 = vmatmul.mubr.msk.f32.vlgmr.msra.gmra.mrb[0].mxu1 %vm93_vm1, %v163_v30  ;;  %v1360_v30 = vsub.s32 6, %v1280_v16 }
 0x13a   :  { %v428_v31 = vrot.slane %v1282_v17, %v1357_v29 }
 0x13b   :  { %v421_v32 = vrot.slane %v1282_v17, %v1360_v30 }
 0x20c   :  { %v240_v36 = vpop.f32.mrb[0].mxu1 }
 0x20d   :  { %v253_v37 = vcombine.high %v240_v36, %v240_v36  ;;  %v260_v38 = vrot.slane %v240_v36, %v259_v35  ;;  %v949_v39 = vpop.f32.mrb[1].mxu1  ;;  %v403_v36 = vpop.permute.xlu1 %402 }
 0x20f   :  { %v267_v40 = vrot.slane %v253_v37, %v259_v35  ;;  %v268_v41 = vcombine.high %v260_v38, %v260_v38  ;;  %v276_v42 = vrot.slane %v260_v38, %v259_v35 }
 0x211   :  { %v269_v43 = vcombine.high %v267_v40, %v267_v40  ;;  %v290_v44 = vrot.slane %v268_v41, %v259_v35  ;;  %v298_v45 = vcombine.high %v276_v42, %v276_v42  ;;  %v283_v47 = vrot.slane %v267_v40, %v259_v35  ;;  %v417_v38 = vpop.permute.xlu1 %416 }
 0x212   :  { %v305_v48 = vrot.slane %v276_v42, %v1291_v20 }
 0x213   :  { %v313_v50 = vrot.slane %v298_v45, %v1291_v20  ;;  %v309_v52 = vrot.slane %v290_v44, %v1291_v20  ;;  %v300_v53 = vcombine.high %v290_v44, %v290_v44  ;;  %v297_v56 = vrot.slane %v269_v43, %v259_v35  ;;  %v382_v35 = vpop.permute.xlu0 %381 }
 0x214   :  { %v342_v54 = vmul.f32 %v305_v48, %v1316_v46  ;;  %v321_v61 = vrot.slane %v283_v47, %v1291_v20  ;;  %v299_v62 = vcombine.high %v283_v47, %v283_v47 }
 0x215   :  { %v344_v57 = vmul.f32 %v313_v50, %v1319_v49  ;;  %v317_v58 = vrot.slane %v300_v53, %v1291_v20  ;;  %v343_v60 = vmul.f32 %v309_v52, %v1322_v51  ;;  %v325_v2 = vrot.slane %v297_v56, %v1291_v20 }
 0x216   :  { %v350_v59 = vsel %vm93_vm1, %v342_v54, 0.0  ;;  %v301_v3 = vcombine.high %v297_v56, %v297_v56  ;;  %v346_v6 = vmul.f32 %v321_v61, %v1335_v1  ;;  %v329_v7 = vrot.slane %v299_v62, %v1291_v20 }
 0x217   :  { %351 = vadd.xlane.f32.xlu0 %v350_v59  ;;  %v356_v63 = vsel %vm93_vm1, %v344_v57, 0.0  ;;  %v345_v0 = vmul.f32 %v317_v58, %v1326_v55  ;;  %v353_v5 = vsel %vm93_vm1, %v343_v60, 0.0  ;;  %v347_v9 = vmul.f32 %v325_v2, %v1338_v4  ;;  %v410_v37 = vpop.permute.xlu0 %409 }
 0x218   :  { %357 = vadd.xlane.f32.xlu1 %v356_v63  ;;  %v333_v11 = vrot.slane %v301_v3, %v1291_v20  ;;  %v362_v13 = vsel %vm93_vm1, %v346_v6, 0.0  ;;  %v348_v14 = vmul.f32 %v329_v7, %v1345_v10  ;;  %v481_v60 = vand.u32 127, %v257_v15 }
 0x219   :  { %v359_v8 = vsel %vm93_vm1, %v345_v0, 0.0  ;;  %v365_v22 = vsel %vm93_vm1, %v347_v9, 0.0 }
 0x21a   :  { %v349_v23 = vmul.f32 %v333_v11, %v1348_v12  ;;  %v368_v24 = vsel %vm93_vm1, %v348_v14, 0.0  ;;  %v1383_v62 = vsub.s32 %v481_v60, %v1280_v16 }
 0x21b   :  { %354 = vadd.xlane.f32.xlu0 %v353_v5 }
 0x21c   :  { %360 = vadd.xlane.f32.xlu1 %v359_v8  ;;  %v371_v26 = vsel %vm93_vm1, %v349_v23, 0.0 }
 0x21f   :  { %363 = vadd.xlane.f32.xlu0 %v362_v13 }
 0x220   :  { %366 = vadd.xlane.f32.xlu1 %v365_v22 }
 0x223   :  { %369 = vadd.xlane.f32.xlu0 %v368_v24 }
 0x224   :  { %372 = vadd.xlane.f32.xlu1 %v371_v26 }
 0x235   :  { %430 = vbcast.lane.b32.xlu1 %v428_v31, 256 }
 0x239   :  { %423 = vbcast.lane.b32.xlu0 %v421_v32, 256 }
 0x2a4   :  { %v352_v39 = vpop.xlane.xlu0 %351 }
 0x2a5   :  { %v1366_v40 = vadd.f32 %v382_v35, %v352_v39  ;;  %v358_v41 = vpop.xlane.xlu1 %357 }
 0x2a6   :  { %v442_v47 = vadd.f32 %v396_v34, %v358_v41 }
 0x2a7   :  { %457 = vperm.xlu0 %976, %v1366_v40  }
 0x2a8   :  { %v355_v42 = vpop.xlane.xlu0 %354 }
 0x2a9   :  { %v441_v43 = vadd.f32 %v389_v33, %v355_v42  ;;  %v361_v44 = vpop.xlane.xlu1 %360 }
 0x2aa   :  { %v1369_v45 = vadd.f32 %v403_v36, %v361_v44 }
 0x2ab   :  { %460 = vperm.xlu1 %977, %v441_v43  }
 0x2ac   :  { %v364_v17 = vpop.xlane.xlu0 %363  ;;  %466 = vperm.xlu0 %976, %v1369_v45  }
 0x2ad   :  { %v367_v48 = vpop.xlane.xlu1 %366  ;;  %v444_v53 = vadd.f32 %v410_v37, %v364_v17 }
 0x2ae   :  { %v1372_v50 = vadd.f32 %v417_v38, %v367_v48 }
 0x2af   :  { %463 = vperm.xlu1 %977, %v442_v47  }
 0x2b0   :  { %v370_v52 = vpop.xlane.xlu0 %369  ;;  %472 = vperm.xlu0 %976, %v1372_v50  }
 0x2b1   :  { %v373_v54 = vpop.xlane.xlu1 %372 }
 0x2b3   :  { %469 = vperm.xlu1 %977, %v444_v53  }
 0x2b4   :  { %v424_v56 = vpop.permute.xlu0 %423 }
 0x2b5   :  { %v1375_v57 = vadd.f32 %v424_v56, %v370_v52  ;;  %v431_v58 = vpop.permute.xlu1 %430 }
 0x2b6   :  { %v1377_v59 = vadd.f32 %v431_v58, %v373_v54 }
 0x2b7   :  { %475 = vperm.xlu1 %977, %v1375_v57  }
 0x2b8   :  { %478 = vperm.xlu0 %976, %v1377_v59  }
 0x326   :  { %v458_v61 = vpop.permute.xlu0 %457 }
 0x327   :  { %v485_v3 = vrot.slane %v458_v61, %v1383_v62 }
 0x32a   :  { %v461_v63 = vpop.permute.xlu1 %460 }
 0x32b   :  { %v489_v0 = vrot.slane %v461_v63, %v1383_v62  ;;  %v467_v2 = vpop.permute.xlu0 %466 }
 0x32c   :  { %v497_v15 = vrot.slane %v467_v2, %v1383_v62 }
 0x32d   :  { %v515_v7 = vsel %vm514_vm2, %v489_v0, %v485_v3 }
 0x32e   :  { %v464_v5 = vpop.permute.xlu1 %463 }
 0x32f   :  { %v493_v6 = vrot.slane %v464_v5, %v1383_v62  ;;  %v473_v9 = vpop.permute.xlu0 %472 }
 0x330   :  { %v505_v22 = vrot.slane %v473_v9, %v1383_v62 }
 0x331   :  { %v517_v8 = vsel %vm516_vm3, %v493_v6, %v515_v7 }
 0x332   :  { %v470_v16 = vpop.permute.xlu1 %469  ;;  %v519_v13 = vsel %vm518_vm4, %v497_v15, %v517_v8 }
 0x333   :  { %v501_v11 = vrot.slane %v470_v16, %v1383_v62 }
 0x335   :  { %v521_v14 = vsel %vm520_vm5, %v501_v11, %v519_v13 }
 0x336   :  { %v476_v23 = vpop.permute.xlu1 %475  ;;  %v523_v31 = vsel %vm522_vm6, %v505_v22, %v521_v14 }
 0x337   :  { %v509_v24 = vrot.slane %v476_v23, %v1383_v62  ;;  %v479_v26 = vpop.permute.xlu0 %478 }
 0x338   :  { %v513_v27 = vrot.slane %v479_v26, %v1383_v62 }
 0x339   :  { %v525_v32 = vsel %vm524_vm7, %v509_v24, %v523_v31 }
 0x33a   :  { %v527_v33 = vsel %vm526_vm8, %v513_v27, %v525_v32 }
 0x33b   :  { %v530_v34 = vsel %vm529_vm9, %v527_v33, -inf }
 0x33c   :  { %531 = vmax.xlane.f32.xlu1 %v530_v34 }
 0x3c9   :  { %v532_v35 = vpop.xlane.xlu1 %531 }
 0x3ca   :  { %v537_v36 = vrot.slane %v532_v35, %v1291_v20  ;;  %v541_v37 = vrot.slane %v532_v35, %v1285_v18  ;;  %v545_v38 = vrot.slane %v532_v35, %v1288_v19  ;;  %v549_v44 = vrot.slane %v532_v35, %v1303_v25 }
 0x3cb   :  { %v553_v52 = vrot.slane %v532_v35, %v1294_v21  ;;  %v557_v58 = vrot.slane %v532_v35, %v1310_v28  ;;  %v565_v2 = vrot.slane %v532_v35, %v1357_v29 }
 0x3cc   :  { %v574_v39 = vsub.f32 %v1366_v40, %v537_v36  ;;  %v575_v41 = vsub.f32 %v441_v43, %v541_v37  ;;  %v576_v17 = vsub.f32 %v442_v47, %v545_v38  ;;  %v577_v54 = vsub.f32 %v1369_v45, %v549_v44 }
 0x3cd   :  { %v578_v60 = vsub.f32 %v444_v53, %v553_v52  ;;  %v561_v40 = vrot.slane %v532_v35, %v1360_v30  ;;  %v579_v43 = vsub.f32 %v1372_v50, %v557_v58  ;;  %v581_v53 = vsub.f32 %v1377_v59, %v565_v2 }
 0x3ce   :  { %v582_v42 = vmul.f32 1.442695, %v574_v39  ;;  %v584_v48 = vmul.f32 1.442695, %v575_v41  ;;  %v586_v56 = vmul.f32 1.442695, %v576_v17 }
 0x3cf   :  { %v588_v61 = vmul.f32 1.442695, %v577_v54  ;;  %v590_v47 = vmul.f32 1.442695, %v578_v60  ;;  %v580_v45 = vsub.f32 %v1375_v57, %v561_v40  ;;  %v592_v3 = vmul.f32 1.442695, %v579_v43 }
 0x3d0   :  { %978 = vpow2.f32 %v582_v42  ;;  %v596_v50 = vmul.f32 1.442695, %v581_v53 }
 0x3d1   :  { %980 = vpow2.f32 %v584_v48  ;;  %v594_v6 = vmul.f32 1.442695, %v580_v45 }
 0x3d2   :  { %982 = vpow2.f32 %v586_v56 }
 0x3d3   :  { %984 = vpow2.f32 %v588_v61 }
 0x3d4   :  { %986 = vpow2.f32 %v590_v47 }
 0x3d5   :  { %988 = vpow2.f32 %v592_v3 }
 0x3d6   :  { %990 = vpow2.f32 %v594_v6 }
 0x3d7   :  { %992 = vpow2.f32 %v596_v50 }
 0x3da   :  { %v979_v63 = vpop.eup %978 }
 0x3db   :  { %607 = vperm.xlu0 %976, %v979_v63   ;;  %v981_v0 = vpop.eup %980 }
 0x3dc   :  { %v983_v5 = vpop.eup %982 }
 0x3dd   :  { %v985_v7 = vpop.eup %984 }
 0x3de   :  { %v987_v8 = vpop.eup %986 }
 0x3df   :  { %610 = vperm.xlu0 %976, %v981_v0   ;;  %v989_v15 = vpop.eup %988 }
 0x3e0   :  { %v991_v16 = vpop.eup %990 }
 0x3e1   :  { %v993_v57 = vpop.eup %992 }
 0x3e3   :  { %613 = vperm.xlu0 %976, %v983_v5  }
 0x3e7   :  { %616 = vperm.xlu0 %976, %v985_v7  }
 0x3eb   :  { %619 = vperm.xlu0 %976, %v987_v8  }
 0x3ef   :  { %622 = vperm.xlu0 %976, %v989_v15  }
 0x3f3   :  { %625 = vperm.xlu0 %976, %v991_v16  }
 0x3f7   :  { %628 = vperm.xlu0 %976, %v993_v57  }
 0x45a   :  { %v608_v9 = vpop.permute.xlu0 %607 }
 0x45b   :  { %v633_v26 = vrot.slane %v608_v9, %v1383_v62 }
 0x45e   :  { %v611_v11 = vpop.permute.xlu0 %610 }
 0x45f   :  { %v637_v23 = vrot.slane %v611_v11, %v1383_v62 }
 0x461   :  { %v662_v33 = vsel %vm514_vm2, %v637_v23, %v633_v26 }
 0x462   :  { %v614_v13 = vpop.permute.xlu0 %613 }
 0x463   :  { %v641_v24 = vrot.slane %v614_v13, %v1383_v62 }
 0x465   :  { %v663_v35 = vsel %vm516_vm3, %v641_v24, %v662_v33 }
 0x466   :  { %v617_v14 = vpop.permute.xlu0 %616 }
 0x467   :  { %v645_v27 = vrot.slane %v617_v14, %v1383_v62 }
 0x469   :  { %v664_v37 = vsel %vm518_vm4, %v645_v27, %v663_v35 }
 0x46a   :  { %v620_v59 = vpop.permute.xlu0 %619 }
 0x46b   :  { %v649_v31 = vrot.slane %v620_v59, %v1383_v62 }
 0x46d   :  { %v665_v38 = vsel %vm520_vm5, %v649_v31, %v664_v37 }
 0x46e   :  { %v623_v22 = vpop.permute.xlu0 %622 }
 0x46f   :  { %v653_v34 = vrot.slane %v623_v22, %v1383_v62 }
 0x471   :  { %v666_v41 = vsel %vm522_vm6, %v653_v34, %v665_v38 }
 0x472   :  { %v626_v32 = vpop.permute.xlu0 %625 }
 0x473   :  { %v657_v36 = vrot.slane %v626_v32, %v1383_v62 }
 0x475   :  { %v667_v44 = vsel %vm524_vm7, %v657_v36, %v666_v41 }
 0x476   :  { %v629_v39 = vpop.permute.xlu0 %628 }
 0x477   :  { %v661_v42 = vrot.slane %v629_v39, %v1383_v62 }
 0x479   :  { %v668_v17 = vsel %vm526_vm8, %v661_v42, %v667_v44 }
 0x47a   :  { %v670_v48 = vsel %vm529_vm9, %v668_v17, 0.0 }
 0x47b   :  { %671 = vadd.xlane.f32.xlu0 %v670_v48 }
 0x508   :  { %v672_v52 = vpop.xlane.xlu0 %671 }
 0x509   :  { %994 = vrcp.f32 %v672_v52 }
 0x513   :  { %v995_v54 = vpop.eup %994 }
 0x514   :  { %v694_v56 = vrot.slane %v995_v54, %v1294_v21  ;;  %v678_v58 = vrot.slane %v995_v54, %v1291_v20  ;;  %v682_v40 = vrot.slane %v995_v54, %v1285_v18  ;;  %v686_v47 = vrot.slane %v995_v54, %v1288_v19 }
 0x515   :  { %v690_v45 = vrot.slane %v995_v54, %v1303_v25  ;;  %v698_v53 = vrot.slane %v995_v54, %v1310_v28  ;;  %v702_v20 = vrot.slane %v995_v54, %v1360_v30  ;;  %v706_v18 = vrot.slane %v995_v54, %v1357_v29 }
 0x516   :  { %v719_v60 = vmul.f32 %v987_v8, %v694_v56  ;;  %v715_v61 = vmul.f32 %v979_v63, %v678_v58  ;;  %v716_v43 = vmul.f32 %v981_v0, %v682_v40  ;;  %v717_v2 = vmul.f32 %v983_v5, %v686_v47 }
 0x517   :  { %v718_v3 = vmul.f32 %v985_v7, %v690_v45  ;;  %v720_v21 = vmul.f32 %v989_v15, %v698_v53  ;;  %v721_v63 = vmul.f32 %v991_v16, %v702_v20  ;;  %v722_v0 = vmul.f32 %v993_v57, %v706_v18 }
 0x518   :  { %745 = vperm.xlu0 %976, %v719_v60   ;;  %725 = vperm.xlu1 %977, %v715_v61  }
 0x51c   :  { %730 = vperm.xlu1 %977, %v716_v43  }
 0x520   :  { %735 = vperm.xlu1 %977, %v717_v2  }
 0x524   :  { %740 = vperm.xlu1 %977, %v718_v3  }
 0x528   :  { %750 = vperm.xlu1 %977, %v720_v21  }
 0x52c   :  { %755 = vperm.xlu1 %977, %v721_v63  }
 0x530   :  { %760 = vperm.xlu1 %977, %v722_v0  }
 0x597   :  { %v726_v19 = vpop.permute.xlu1 %725  ;;  %v746_v7 = vpop.permute.xlu0 %745 }
 0x598   :  { %v763_v5 = vmul.f32 %v726_v19, %v1316_v46  ;;  %v767_v30 = vmul.f32 %v746_v7, %v1335_v1  ;;  %v847_v32 = vrot.slane %v726_v19, %v1383_v62  ;;  %v863_v58 = vrot.slane %v746_v7, %v1383_v62 }
 0x59a   :  { %v771_v25 = vsel %vm93_vm1, %v763_v5, 0.0  ;;  %v799_v46 = vsel %vm93_vm1, %v767_v30, 0.0 }
 0x59b   :  { %v731_v6 = vpop.permute.xlu1 %730  ;;  %v772_v50 = vrot.slane %v771_v25, 4  ;;  %v800_v22 = vrot.slane %v799_v46, 4 }
 0x59c   :  { %v764_v28 = vmul.f32 %v731_v6, %v1322_v51  ;;  %v851_v24 = vrot.slane %v731_v6, %v1383_v62 }
 0x59d   :  { %v773_v57 = vadd.f32 %v772_v50, %v771_v25  ;;  %v801_v36 = vadd.f32 %v800_v22, %v799_v46 }
 0x59e   :  { %v778_v8 = vsel %vm93_vm1, %v764_v28, 0.0  ;;  %v876_v38 = vsel %vm514_vm2, %v851_v24, %v847_v32 }
 0x59f   :  { %v779_v15 = vrot.slane %v778_v8, 4  ;;  %v736_v16 = vpop.permute.xlu1 %735  ;;  %v774_v23 = vrot.slane %v773_v57, 2  ;;  %v802_v43 = vrot.slane %v801_v36, 2 }
 0x5a0   :  { %v765_v29 = vmul.f32 %v736_v16, %v1319_v49  ;;  %v855_v49 = vrot.slane %v736_v16, %v1383_v62 }
 0x5a1   :  { %v780_v11 = vadd.f32 %v779_v15, %v778_v8  ;;  %v775_v37 = vadd.f32 %v774_v23, %v773_v57  ;;  %v803_v7 = vadd.f32 %v802_v43, %v801_v36 }
 0x5a2   :  { %v785_v9 = vsel %vm93_vm1, %v765_v29, 0.0  ;;  %v877_v42 = vsel %vm516_vm3, %v855_v49, %v876_v38 }
 0x5a3   :  { %v786_v13 = vrot.slane %v785_v9, 4  ;;  %v741_v14 = vpop.permute.xlu1 %740  ;;  %v781_v26 = vrot.slane %v780_v11, 2  ;;  %v776_v47 = vrot.slane %v775_v37, 1 }
 0x5a4   :  { %v766_v59 = vmul.f32 %v741_v14, %v1326_v55  ;;  %v859_v34 = vrot.slane %v741_v14, %v1383_v62 }
 0x5a5   :  { %v787_v51 = vadd.f32 %v786_v13, %v785_v9  ;;  %v782_v41 = vadd.f32 %v781_v26, %v780_v11  ;;  %v777_v16 = vadd.f32 %v776_v47, %v775_v37 }
 0x5a6   :  { %v792_v1 = vsel %vm93_vm1, %v766_v59, 0.0  ;;  %v878_v54 = vsel %vm518_vm4, %v859_v34, %v877_v42 }
 0x5a7   :  { %v793_v27 = vrot.slane %v792_v1, 4  ;;  %v751_v31 = vpop.permute.xlu1 %750  ;;  %v788_v33 = vrot.slane %v787_v51, 2  ;;  %v783_v45 = vrot.slane %v782_v41, 1  ;;  %v879_v3 = vsel %vm520_vm5, %v863_v58, %v878_v54 }
 0x5a8   :  { %v768_v35 = vmul.f32 %v751_v31, %v1338_v4  ;;  %v867_v56 = vrot.slane %v751_v31, %v1383_v62 }
 0x5a9   :  { %v794_v55 = vadd.f32 %v793_v27, %v792_v1  ;;  %v789_v52 = vadd.f32 %v788_v33, %v787_v51  ;;  %v784_v8 = vadd.f32 %v783_v45, %v782_v41 }
 0x5aa   :  { %v806_v39 = vsel %vm93_vm1, %v768_v35, 0.0 }
 0x5ab   :  { %v795_v44 = vrot.slane %v794_v55, 2  ;;  %v807_v17 = vrot.slane %v806_v39, 4  ;;  %v756_v48 = vpop.permute.xlu1 %755  ;;  %v790_v63 = vrot.slane %v789_v52, 1 }
 0x5ac   :  { %v769_v4 = vmul.f32 %v756_v48, %v1345_v10  ;;  %v871_v40 = vrot.slane %v756_v48, %v1383_v62  ;;  %v880_v10 = vsel %vm522_vm6, %v867_v56, %v879_v3 }
 0x5ad   :  { %v796_v60 = vadd.f32 %v795_v44, %v794_v55  ;;  %v808_v61 = vadd.f32 %v807_v17, %v806_v39 }
 0x5ae   :  { %v813_v2 = vsel %vm93_vm1, %v769_v4, 0.0  ;;  %v881_v6 = vsel %vm524_vm7, %v871_v40, %v880_v10 }
 0x5af   :  { %v809_v53 = vrot.slane %v808_v61, 2  ;;  %v814_v21 = vrot.slane %v813_v2, 4  ;;  %v761_v20 = vpop.permute.xlu1 %760  ;;  %v797_v19 = vrot.slane %v796_v60, 1 }
 0x5b0   :  { %v770_v18 = vmul.f32 %v761_v20, %v1348_v12  ;;  %v875_v0 = vrot.slane %v761_v20, %v1383_v62  ;;  %v791_v12 = vadd.f32 %v790_v63, %v789_v52 }
 0x5b1   :  { %v810_v5 = vadd.f32 %v809_v53, %v808_v61  ;;  %v815_v25 = vadd.f32 %v814_v21, %v813_v2 }
 0x5b2   :  { %v820_v28 = vsel %vm93_vm1, %v770_v18, 0.0  ;;  %v882_v50 = vsel %vm526_vm8, %v875_v0, %v881_v6 }
 0x5b3   :  { %v816_v30 = vrot.slane %v815_v25, 2  ;;  %v821_v15 = vrot.slane %v820_v28, 4  ;;  %884 = vst.msk [vmem:[#allocation12] sm:$0xff] %vm529_vm9, %v882_v50 }
 0x5b4   :  { %1117 = shalt.err (!%p1114_p2)
}
 0x5b5   :  { %s1118_s11 = scalar_lea.hbm %s1508_s6, 128 }
 0x5b6   :  { %p1119_p3 = scmp.ne.s32.totalorder %s1508_s6, %s1118_s11  ;;  %p1122_p4 = scmp.lt.u32.totalorder %s1118_s11, %s1508_s6 }
 0x5b8   :  { %p1124_p5 = pnand %p1122_p4, %p1119_p3 }
 0x5ba   :  { %1127 = shalt.err (!%p1124_p5)
}
 0x5bb   :  { %904 = dma.vmem_to_hbm [thread:$0]  %s902_s7, 128, %s1508_s6, [#allocation13]   ;;  %v798_v62 = vadd.f32 %v797_v19, %v796_v60  ;;  %v811_v29 = vrot.slane %v810_v5, 1  ;;  %v817_v57 = vadd.f32 %v816_v30, %v815_v25  ;;  %v822_v9 = vadd.f32 %v821_v15, %v820_v28 }
 0x5bc   :  { %v804_v46 = vrot.slane %v803_v7, 1  ;;  %v835_v11 = vsel %vm514_vm2, %v784_v8, %v777_v16  ;;  %s1173_s19 = smov [#allocation11]  }
 0x5bd   :  { %v818_v13 = vrot.slane %v817_v57, 1  ;;  %v823_v14 = vrot.slane %v822_v9, 2  ;;  %v836_v59 = vsel %vm516_vm3, %v791_v12, %v835_v11  ;;  %v812_v51 = vadd.f32 %v811_v29, %v810_v5  ;;  %s891_s6 = sshll.u32 %s1173_s19, 4  ;;  %s892_s6 = int_to_ptr.vmem [resolvable:$true] %s891_s6 }
 0x5be   :  { %v837_v23 = vsel %vm518_vm4, %v798_v62, %v836_v59  ;;  %v805_v24 = vadd.f32 %v804_v46, %v803_v7  ;;  %s1128_s20 = scalar_lea.vmem %s892_s6, 128  ;;  %p1133_p7 = scmp.lt.s32.totalorder %s892_s6, %s892_s6 }
 0x5bf   :  { %v824_v22 = vadd.f32 %v823_v14, %v822_v9  ;;  %v819_v1 = vadd.f32 %v818_v13, %v817_v57  ;;  %p1129_p6 = scmp.ne.s32.totalorder %s892_s6, %s1128_s20  ;;  %p1134_p8 = scmp.lt.s32.totalorder %s1128_s20, %s1128_s20 }
 0x5c0   :  { %v838_v49 = vsel %vm520_vm5, %v805_v24, %v837_v23 }
 0x5c1   :  { %v825_v26 = vrot.slane %v824_v22, 1  ;;  %v839_v31 = vsel %vm522_vm6, %v812_v51, %v838_v49  ;;  %p1135_p9 = por %p1134_p8, %p1133_p7 }
 0x5c2   :  { %v840_v32 = vsel %vm524_vm7, %v819_v1, %v839_v31 }
 0x5c3   :  { %v826_v27 = vadd.f32 %v825_v26, %v824_v22  ;;  %p1136_p10 = pnand %p1135_p9, %p1129_p6 }
 0x5c5   :  { %v841_v33 = vsel %vm526_vm8, %v826_v27, %v840_v32 }
 0x5c6   :  { %843 = vst.msk [vmem:[#allocation11] sm:$0xff] %vm93_vm1, %v841_v33 }
 0x5c7   :  { %1139 = shalt.err (!%p1136_p10)
}
 0x5c8   :  { %s1140_s0 = scalar_lea.hbm %s1507_s5, 128 }
 0x5c9   :  { %p1141_p11 = scmp.ne.s32.totalorder %s1507_s5, %s1140_s0  ;;  %p1144_p12 = scmp.lt.u32.totalorder %s1140_s0, %s1507_s5 }
 0x5cb   :  { %p1146_p13 = pnand %p1144_p12, %p1141_p11 }
 0x5cd   :  { %1149 = shalt.err (!%p1146_p13)
}
 0x5ce   :  { %894 = dma.vmem_to_hbm [thread:$0]  %s892_s6, 128, %s1507_s5, [#allocation4]  }
 0x5cf   :  { %1156 = dma.done.wait [#allocation4], 128  }
 0x5d0   :  { %1157 = vsyncadd [#allocation4], 4294967168 }
 0x5d1   :  { %1158 = dma.done.wait [#allocation13], 128  }
 0x5d2   :  { %1159 = vsyncadd [#allocation13], 4294967168 }
 0x5d3   :  { %911 = vsyncpa [#allocation3], 1 }
 0x5d4   :  { %912 = vsyncpa [#allocation6], 1 }
 0x5d5   :  { %913 = vsyncpa [#allocation9], 1 }
 0x5d6   :  { %914 = vsyncpa [#allocation4], 1 }
 0x5d7   :  { %915 = vsyncpa [#allocation13], 1 }

</bundles_post_ra>
